<compile_context>
chip_gen: v7x
topology: tpu7x:2x2x1
jax: 0.10.0
libtpu: 0.0.40
codegen_flags: <defaults>
</compile_context>

<pallas_src>
import math

import jax
import jax.numpy as jnp
from jax import lax
from jax.experimental import pallas as pl
from jax.experimental.pallas import tpu as pltpu


def _vit_intermediate_kernel(x_ref, w_ref, b_ref, o_ref):
    # x_ref: (tm, H), w_ref: (H, I), b_ref: (1, I), o_ref: (tm, I)
    y = jnp.dot(x_ref[...], w_ref[...], preferred_element_type=jnp.float32)
    y = y + b_ref[...].astype(jnp.float32)
    # Exact (erf-based) GELU in f32, matching torch.nn.functional.gelu default.
    g = 0.5 * y * (1.0 + lax.erf(y * (1.0 / math.sqrt(2.0))))
    o_ref[...] = g.astype(o_ref.dtype)


def vit_intermediate(hidden_state: jnp.ndarray,
                     weight: jnp.ndarray,
                     bias: jnp.ndarray,
                     *,
                     tm: int = 256) -> jnp.ndarray:
    """hidden_state: (B, S, H); weight: (H, I); bias: (I,). Returns (B, S, I)."""
    B, S, H = hidden_state.shape
    I = weight.shape[1]
    M = B * S

    x2d = hidden_state.reshape(M, H)
    b2d = bias.reshape(1, I)

    # Row tile: sublane-aligned (multiple of 8), no larger than the padded row
    # count. Pad M so the grid divides evenly; padded rows are sliced off below.
    m_pad8 = ((M + 7) // 8) * 8
    tm_eff = max(8, min(tm, m_pad8))
    m_padded = pl.cdiv(M, tm_eff) * tm_eff
    if m_padded != M:
        x2d = jnp.pad(x2d, ((0, m_padded - M), (0, 0)))

    x_isz = jnp.dtype(hidden_state.dtype).itemsize
    w_isz = jnp.dtype(weight.dtype).itemsize
    vmem_bytes = (
        H * I * w_isz                 # weight (single-buffered, resident)
        + I * w_isz                   # bias
        + 2 * tm_eff * H * x_isz      # activation row tile, double-buffered
        + 2 * tm_eff * I * x_isz      # output tile, double-buffered
        + (4 << 20)                   # headroom for compiler scratch
    )
    vmem_bytes = int(min(max(vmem_bytes, 16 << 20), 100 << 20))

    cost = pl.CostEstimate(
        flops=2 * m_padded * H * I,
        transcendentals=m_padded * I,
        bytes_accessed=x_isz * (m_padded * H + m_padded * I)
        + w_isz * (H * I + I),
    )

    out2d = pl.pallas_call(
        _vit_intermediate_kernel,
        out_shape=jax.ShapeDtypeStruct((m_padded, I), hidden_state.dtype),
        grid_spec=pltpu.PrefetchScalarGridSpec(
            num_scalar_prefetch=0,
            grid=(m_padded // tm_eff,),
            in_specs=[
                # Activation row tile: streamed (default double-buffer).
                pl.BlockSpec((tm_eff, H), lambda i: (i, 0)),
                # Weight: constant index_map -> resident, single-buffered.
                pl.BlockSpec((H, I), lambda i: (0, 0),
                             pipeline_mode=pl.Buffered(1)),
                # Bias: constant index_map -> resident, single-buffered.
                pl.BlockSpec((1, I), lambda i: (0, 0),
                             pipeline_mode=pl.Buffered(1)),
            ],
            out_specs=pl.BlockSpec((tm_eff, I), lambda i: (i, 0)),
        ),
        compiler_params=pltpu.CompilerParams(
            dimension_semantics=("parallel",),
            vmem_limit_bytes=vmem_bytes,
        ),
        cost_estimate=cost,
    )(x2d, weight, b2d)

    if m_padded != M:
        out2d = out2d[:M]
    return out2d.reshape(B, S, I)


if __name__ == "__main__":
    # Small, ViT-shaped config: hidden_size=128, intermediate_size=256.
    # S=9 (not a multiple of 8) exercises the padded-tail path.
    B, S = 2, 9
    hidden_size = 128
    intermediate_size = 256

    key = jax.random.PRNGKey(0)
    kx, kw, kb = jax.random.split(key, 3)

    # PyTorch stores nn.Linear weight as (out, in); we keep (in, out) for x @ W.
    weight = (jax.random.normal(kw, (hidden_size, intermediate_size), jnp.float32)
              * 0.02)
    bias = jax.random.normal(kb, (intermediate_size,), jnp.float32) * 0.02
    x = jax.random.normal(kx, (B, S, hidden_size), jnp.float32)

    # Reference (exact erf GELU) in plain JAX.
    ref = x.reshape(-1, hidden_size) @ weight + bias
    ref = 0.5 * ref * (1.0 + lax.erf(ref / math.sqrt(2.0)))
    ref = ref.reshape(B, S, intermediate_size)

    # Default large row tile (single grid step at this size).
    out = jax.block_until_ready(vit_intermediate(x, weight, bias))
    assert out.shape == (B, S, intermediate_size)
    assert jnp.allclose(out, ref, atol=1e-5, rtol=1e-5)

    # Small explicit tile to exercise multi-step grid + padding path.
    out_tiled = jax.block_until_ready(vit_intermediate(x, weight, bias, tm=8))
    assert jnp.allclose(out_tiled, ref, atol=1e-5, rtol=1e-5)

    print("KERNEL_OK")
</pallas_src>

<mosaic_0001>
module attributes {stable_mosaic.version = 11 : i64} {
  func.func @_vit_intermediate_kernel(%arg0: i32, %arg1: memref<24x128xf32, #tpu.memory_space<vmem>>, %arg2: memref<128x256xf32, #tpu.memory_space<vmem>>, %arg3: memref<1x256xf32, #tpu.memory_space<vmem>>, %arg4: memref<24x256xf32, #tpu.memory_space<vmem>>) attributes {dimension_semantics = [#tpu.dimension_semantics<parallel>], iteration_bounds = array<i64: 1>, scalar_prefetch = 0 : i64, scratch_operands = 0 : i64, tpu.core_type = #tpu.core_type<tc>, window_params = [{transform_indices = @transform_0, window_bounds = array<i64: 24, 128>}, {pipeline_mode = #tpu.pipeline_mode<synchronous>, transform_indices = @transform_1, window_bounds = array<i64: 128, 256>}, {pipeline_mode = #tpu.pipeline_mode<synchronous>, transform_indices = @transform_2, window_bounds = array<i64: 1, 256>}, {transform_indices = @transform_3, window_bounds = array<i64: 24, 256>}]} {
    %c0 = arith.constant 0 : index
    %c0_0 = arith.constant 0 : index
    %0 = vector.load %arg1[%c0, %c0_0] : memref<24x128xf32, #tpu.memory_space<vmem>>, vector<24x128xf32>
    %c0_1 = arith.constant 0 : index
    %c0_2 = arith.constant 0 : index
    %1 = vector.load %arg2[%c0_1, %c0_2] : memref<128x256xf32, #tpu.memory_space<vmem>>, vector<128x256xf32>
    %cst = arith.constant dense<0.000000e+00> : vector<24x256xf32>
    %2 = tpu.matmul %0, %1, %cst {dimension_numbers = #tpu.dot_dimension_numbers<[1], [0], [0], [1], [0, 0, 1, 1], [], []>} : vector<24x128xf32>, vector<128x256xf32>, vector<24x256xf32> -> vector<24x256xf32>
    %c0_3 = arith.constant 0 : index
    %c0_4 = arith.constant 0 : index
    %3 = vector.load %arg3[%c0_3, %c0_4] : memref<1x256xf32, #tpu.memory_space<vmem>>, vector<1x256xf32>
    %4 = vector.broadcast %3 : vector<1x256xf32> to vector<24x256xf32>
    %5 = arith.addf %2, %4 : vector<24x256xf32>
    %cst_5 = arith.constant 5.000000e-01 : f32
    %6 = vector.broadcast %cst_5 : f32 to vector<24x256xf32>
    %7 = arith.mulf %6, %5 : vector<24x256xf32>
    %cst_6 = arith.constant 0.707106769 : f32
    %8 = vector.broadcast %cst_6 : f32 to vector<24x256xf32>
    %9 = arith.mulf %5, %8 : vector<24x256xf32>
    %10 = math.erf %9 : vector<24x256xf32>
    %cst_7 = arith.constant 1.000000e+00 : f32
    %11 = vector.broadcast %cst_7 : f32 to vector<24x256xf32>
    %12 = arith.addf %11, %10 : vector<24x256xf32>
    %13 = arith.mulf %7, %12 : vector<24x256xf32>
    %c0_8 = arith.constant 0 : index
    %c0_9 = arith.constant 0 : index
    %14 = vector.load %arg4[%c0_8, %c0_9] : memref<24x256xf32, #tpu.memory_space<vmem>>, vector<24x256xf32>
    tpu.vector_store %arg4[%c0_8, %c0_9], %13 {strides = array<i32>} : memref<24x256xf32, #tpu.memory_space<vmem>>, vector<24x256xf32>,
    return
  }
  func.func @transform_0(%arg0: i32) -> (i32, i32) {
    %c0_i32 = arith.constant 0 : i32
    %c0_i32_0 = arith.constant 0 : i32
    return %arg0, %c0_i32 : i32, i32
  }
  func.func @transform_1(%arg0: i32) -> (i32, i32) {
    %c0_i32 = arith.constant 0 : i32
    %c0_i32_0 = arith.constant 0 : i32
    %c0_i32_1 = arith.constant 0 : i32
    return %c0_i32, %c0_i32_0 : i32, i32
  }
  func.func @transform_2(%arg0: i32) -> (i32, i32) {
    %c0_i32 = arith.constant 0 : i32
    %c0_i32_0 = arith.constant 0 : i32
    %c0_i32_1 = arith.constant 0 : i32
    return %c0_i32, %c0_i32_0 : i32, i32
  }
  func.func @transform_3(%arg0: i32) -> (i32, i32) {
    %c0_i32 = arith.constant 0 : i32
    %c0_i32_0 = arith.constant 0 : i32
    return %arg0, %c0_i32 : i32, i32
  }
}

</mosaic_0001>

<bundles_post_ra>
// kernel: tpu_custom_call.1
= control target key start
LH: loop header
LB: loop body
LE: loop exit
PB: predicated region body
PF: predicated region fallthrough
CT: control target
= control target key end

     0   :  { %8 = vsyncpa [#allocation3], 0  ;;  %s443_s0 = inlined_call_operand.hbm [shape: f32[24,128], index: 0, kind: input, shape index: {}]   ;;  %s444_s1 = inlined_call_operand.hbm [shape: f32[128,256], index: 1, kind: input, shape index: {}]   ;;  %s445_s2 = inlined_call_operand.vmem [shape: f32[1,256], index: 2, kind: input, shape index: {}]   ;;  %s446_s3 = inlined_call_operand.hbm [shape: f32[24,256], index: 3, kind: output, shape index: {}]  }
   0x1   :  { %9 = vsyncpa [#allocation6], 0 }
   0x2   :  { %10 = vsyncpa [#allocation4], 0  ;;  %s367_s12 = smov [#allocation2]   ;;  %s295_s16 = scalar_lea.hbm %s443_s0, 384 }
   0x3   :  { %s16_s13 = sshll.u32 %s367_s12, 4  ;;  %p296_p0 = scmp.ne.s32.totalorder %s443_s0, %s295_s16  ;;  %s17_s13 = int_to_ptr.vmem [resolvable:$true] %s16_s13 }
   0x4   :  { %p299_p1 = scmp.lt.u32.totalorder %s295_s16, %s443_s0 }
   0x6   :  { %p301_p2 = pnand %p299_p1, %p296_p0 }
   0x8   :  { %304 = shalt.err (!%p301_p2)
}
   0x9   :  { %s305_s21 = scalar_lea.vmem %s17_s13, 384  ;;  %p310_p4 = scmp.lt.s32.totalorder %s17_s13, %s17_s13 }
   0xa   :  { %p306_p3 = scmp.ne.s32.totalorder %s17_s13, %s305_s21  ;;  %p311_p5 = scmp.lt.s32.totalorder %s305_s21, %s305_s21 }
   0xc   :  { %p312_p6 = por %p311_p5, %p310_p4 }
   0xe   :  { %p313_p7 = pnand %p312_p6, %p306_p3 }
  0x10   :  { %316 = shalt.err (!%p313_p7)
}
  0x11   :  { %s368_s22 = smov 128   ;;  %s369_s23 = smov 8  }
  0x12   :  { %22 = dma.hbm_to_vmem [thread:$0]  %s443_s0, 384, %s17_s13, [#allocation3], %s368_s22, %s368_s22, %s369_s23  }
  0x13   :  { %s370_s26 = smov [#allocation5]   ;;  %s317_s30 = scalar_lea.hbm %s444_s1, 4096 }
  0x14   :  { %s28_s27 = sshll.u32 %s370_s26, 4  ;;  %p318_p8 = scmp.ne.s32.totalorder %s444_s1, %s317_s30  ;;  %s29_s27 = int_to_ptr.vmem [resolvable:$true] %s28_s27 }
  0x15   :  { %p321_p9 = scmp.lt.u32.totalorder %s317_s30, %s444_s1 }
  0x17   :  { %p323_p10 = pnand %p321_p9, %p318_p8 }
  0x19   :  { %326 = shalt.err (!%p323_p10)
}
  0x1a   :  { %s327_s8 = scalar_lea.vmem %s29_s27, 4096  ;;  %p332_p12 = scmp.lt.s32.totalorder %s29_s27, %s29_s27 }
  0x1b   :  { %p328_p11 = scmp.ne.s32.totalorder %s29_s27, %s327_s8  ;;  %p333_p13 = scmp.lt.s32.totalorder %s327_s8, %s327_s8 }
  0x1d   :  { %p334_p0 = por %p333_p13, %p332_p12 }
  0x1f   :  { %p335_p1 = pnand %p334_p0, %p328_p11 }
  0x21   :  { %338 = shalt.err (!%p335_p1)
}
  0x22   :  { %s371_s0 = smov 256   ;;  %s372_s9 = smov 16  }
  0x23   :  { %34 = dma.hbm_to_vmem [thread:$0]  %s444_s1, 4096, %s29_s27, [#allocation6], %s371_s0, %s371_s0, %s372_s9  }
  0x24   :  { %361 = dma.done.wait [#allocation3], 384  }
  0x25   :  { %362 = vsyncadd [#allocation3], 4294966912 }
  0x26   :  { %363 = dma.done.wait [#allocation6], 4096  }
  0x27   :  { %364 = vsyncadd [#allocation6], 4294963200  ;;  %v373_v0 = vmov 0.0   ;;  %v47_v1 = vld [vmem:[#allocation5 + $0x8] sm:$0xff]  ;;  %v49_v2 = vld [vmem:[#allocation5 + $0x18] sm:$0xff]  ;;  %v80_v52 = vlaneseq }
  0x28   :  { %154 = vmatprep.mubr.f32.mxu0 %v373_v0  ;;  %160 = vmatprep.mubr.f32.mxu1 %v373_v0  ;;  %v46_v3 = vld [vmem:[#allocation5] sm:$0xff]  ;;  %v227_v4 = vpack.c.bf16 %v49_v2, %v47_v1  ;;  %v48_v5 = vld [vmem:[#allocation5 + $0x10] sm:$0xff]  ;;  %v51_v6 = vld [vmem:[#allocation5 + $0x28] sm:$0xff] }
  0x29   :  { %v53_v7 = vld [vmem:[#allocation5 + $0x38] sm:$0xff]  ;;  %v229_v8 = vpack.c.bf16 %v48_v5, %v46_v3  ;;  %v50_v10 = vld [vmem:[#allocation5 + $0x20] sm:$0xff]  ;;  %v52_v11 = vld [vmem:[#allocation5 + $0x30] sm:$0xff]  ;;  %v81_v53 = vshrl.u32 %v80_v52, 7 }
  0x2a   :  { %v231_v9 = vpack.c.bf16 %v53_v7, %v51_v6  ;;  %v55_v12 = vld [vmem:[#allocation5 + $0x48] sm:$0xff]  ;;  %228 = vmatprep.subr.bf16.mxu0 %v227_v4  ;;  %259 = vmatprep.subr.bf16.mxu1 %v227_v4  ;;  %v57_v13 = vld [vmem:[#allocation5 + $0x58] sm:$0xff]  ;;  %v233_v14 = vpack.c.bf16 %v52_v11, %v50_v10  ;;  %v54_v16 = vld [vmem:[#allocation5 + $0x40] sm:$0xff] }
  0x2b   :  { %230 = vmatpush1.bf16.msra.mxu0 %v229_v8  ;;  %267 = vmatpush1.bf16.msra.mxu1 %v229_v8  ;;  %v235_v15 = vpack.c.bf16 %v57_v13, %v55_v12  ;;  %v56_v17 = vld [vmem:[#allocation5 + $0x50] sm:$0xff]  ;;  %v59_v18 = vld [vmem:[#allocation5 + $0x68] sm:$0xff]  ;;  %v61_v19 = vld [vmem:[#allocation5 + $0x78] sm:$0xff]  ;;  %v82_v54 = vsub.s32 0, %v81_v53  ;;  %v86_v56 = vsub.s32 1, %v81_v53 }
  0x2c   :  { %232 = vmatprep.subr.bf16.mxu0 %v231_v9  ;;  %260 = vmatprep.subr.bf16.mxu1 %v231_v9  ;;  %v237_v20 = vpack.c.bf16 %v56_v17, %v54_v16  ;;  %v239_v21 = vpack.c.bf16 %v61_v19, %v59_v18  ;;  %v58_v22 = vld [vmem:[#allocation5 + $0x60] sm:$0xff]  ;;  %v60_v23 = vld [vmem:[#allocation5 + $0x70] sm:$0xff]  ;;  %v63_v24 = vld [vmem:[#allocation5 + $0x88] sm:$0xff] }
  0x2d   :  { %v65_v25 = vld [vmem:[#allocation5 + $0x98] sm:$0xff]  ;;  %v241_v26 = vpack.c.bf16 %v60_v23, %v58_v22  ;;  %v62_v28 = vld [vmem:[#allocation5 + $0x80] sm:$0xff]  ;;  %v64_v29 = vld [vmem:[#allocation5 + $0x90] sm:$0xff] }
  0x2e   :  { %v243_v27 = vpack.c.bf16 %v65_v25, %v63_v24  ;;  %v67_v30 = vld [vmem:[#allocation5 + $0xa8] sm:$0xff]  ;;  %v69_v31 = vld [vmem:[#allocation5 + $0xb8] sm:$0xff]  ;;  %v245_v32 = vpack.c.bf16 %v64_v29, %v62_v28  ;;  %v66_v34 = vld [vmem:[#allocation5 + $0xa0] sm:$0xff] }
  0x2f   :  { %234 = vmatpush1.bf16.msra.mxu0 %v233_v14  ;;  %268 = vmatpush1.bf16.msra.mxu1 %v233_v14  ;;  %v247_v33 = vpack.c.bf16 %v69_v31, %v67_v30  ;;  %v68_v35 = vld [vmem:[#allocation5 + $0xb0] sm:$0xff]  ;;  %v71_v36 = vld [vmem:[#allocation5 + $0xc8] sm:$0xff]  ;;  %v73_v37 = vld [vmem:[#allocation5 + $0xd8] sm:$0xff] }
  0x30   :  { %236 = vmatprep.subr.bf16.mxu0 %v235_v15  ;;  %261 = vmatprep.subr.bf16.mxu1 %v235_v15  ;;  %v249_v38 = vpack.c.bf16 %v68_v35, %v66_v34  ;;  %v251_v39 = vpack.c.bf16 %v73_v37, %v71_v36  ;;  %v70_v40 = vld [vmem:[#allocation5 + $0xc0] sm:$0xff]  ;;  %v72_v41 = vld [vmem:[#allocation5 + $0xd0] sm:$0xff]  ;;  %v75_v42 = vld [vmem:[#allocation5 + $0xe8] sm:$0xff] }
  0x31   :  { %v77_v43 = vld [vmem:[#allocation5 + $0xf8] sm:$0xff]  ;;  %v253_v44 = vpack.c.bf16 %v72_v41, %v70_v40  ;;  %v74_v46 = vld [vmem:[#allocation5 + $0xe0] sm:$0xff]  ;;  %v76_v47 = vld [vmem:[#allocation5 + $0xf0] sm:$0xff] }
  0x32   :  { %v255_v45 = vpack.c.bf16 %v77_v43, %v75_v42  ;;  %v257_v48 = vpack.c.bf16 %v76_v47, %v74_v46  ;;  %v43_v49 = vld [vmem:[#allocation2] sm:$0xff]  ;;  %v44_v50 = vld [vmem:[#allocation2 + $0x8] sm:$0xff]  ;;  %v45_v51 = vld [vmem:[#allocation2 + $0x10] sm:$0xff] }
  0x33   :  { %238 = vmatpush1.bf16.msra.mxu0 %v237_v20  ;;  %269 = vmatpush1.bf16.msra.mxu1 %v237_v20  ;;  %v78_v55 = vld [vmem:[%s445_s2] sm:$0x3]  ;;  %s374_s2 = smov [#allocation7]  }
  0x34   :  { %240 = vmatprep.subr.bf16.mxu0 %v239_v21  ;;  %262 = vmatprep.subr.bf16.mxu1 %v239_v21  ;;  %v83_v57 = vrot.slane %v78_v55, %v82_v54  ;;  %v87_v58 = vrot.slane %v78_v55, %v86_v56  ;;  %s214_s13 = sshll.u32 %s374_s2, 4  ;;  %s215_s13 = int_to_ptr.vmem [resolvable:$true] %s214_s13 }
  0x35   :  { %s339_s14 = scalar_lea.vmem %s215_s13, 768  ;;  %p344_p3 = scmp.lt.s32.totalorder %s215_s13, %s215_s13 }
  0x36   :  { %p340_p2 = scmp.ne.s32.totalorder %s215_s13, %s339_s14  ;;  %p345_p4 = scmp.lt.s32.totalorder %s339_s14, %s339_s14 }
  0x37   :  { %242 = vmatpush1.bf16.msra.mxu0 %v241_v26  ;;  %270 = vmatpush1.bf16.msra.mxu1 %v241_v26 }
  0x38   :  { %244 = vmatprep.subr.bf16.mxu0 %v243_v27  ;;  %263 = vmatprep.subr.bf16.mxu1 %v243_v27  ;;  %p346_p5 = por %p345_p4, %p344_p3 }
  0x3a   :  { %p347_p6 = pnand %p346_p5, %p340_p2 }
  0x3b   :  { %246 = vmatpush1.bf16.msra.mxu0 %v245_v32  ;;  %271 = vmatpush1.bf16.msra.mxu1 %v245_v32 }
  0x3c   :  { %248 = vmatprep.subr.bf16.mxu0 %v247_v33  ;;  %264 = vmatprep.subr.bf16.mxu1 %v247_v33 }
  0x3f   :  { %250 = vmatpush1.bf16.msra.mxu0 %v249_v38  ;;  %272 = vmatpush1.bf16.msra.mxu1 %v249_v38 }
  0x40   :  { %252 = vmatprep.subr.bf16.mxu0 %v251_v39  ;;  %265 = vmatprep.subr.bf16.mxu1 %v251_v39 }
  0x43   :  { %254 = vmatpush1.bf16.msra.mxu0 %v253_v44  ;;  %273 = vmatpush1.bf16.msra.mxu1 %v253_v44 }
  0x44   :  { %256 = vmatprep.subr.bf16.mxu0 %v255_v45  ;;  %266 = vmatprep.subr.bf16.mxu1 %v255_v45 }
  0x47   :  { %258 = vmatpush1.bf16.msra.mxu0 %v257_v48  ;;  %274 = vmatpush1.bf16.msra.mxu1 %v257_v48 }
  0x4a   :  { %155 = vmatmul.mubr.f32.vlgmr.msra.gmra.mrb[0].mxu0 %v43_v49  ;;  %161 = vmatmul.mubr.f32.vlgmr.msra.gmra.mrb[0].mxu1 %v44_v50 }
  0x4b   :  { %166 = vmatprep.mubr.f32.mxu1 %v373_v0 }
  0x4e   :  { %167 = vmatmul.mubr.f32.gmra.mrb[2].mxu1 %v45_v51 }
 0x11d   :  { %v156_v59 = vpop.f32.mrb[0].mxu0  ;;  %v162_v60 = vpop.f32.mrb[0].mxu1 }
 0x11e   :  { %v157_v61 = vadd.f32 %v156_v59, %v83_v57  ;;  %v163_v62 = vadd.f32 %v162_v60, %v83_v57  ;;  %v158_v63 = vpop.f32.mrb[1].mxu0  ;;  %v164_v1 = vpop.f32.mrb[1].mxu1 }
 0x11f   :  { %v159_v2 = vadd.f32 %v158_v63, %v87_v58  ;;  %v165_v0 = vadd.f32 %v164_v1, %v87_v58 }
 0x120   :  { %v179_v3 = vmul.f32 0.70710677, %v157_v61  ;;  %v181_v4 = vmul.f32 0.70710677, %v163_v62  ;;  %v173_v15 = vmul.f32 0.5, %v157_v61  ;;  %v175_v18 = vmul.f32 0.5, %v163_v62 }
 0x121   :  { %v180_v5 = vmul.f32 0.70710677, %v159_v2  ;;  %v182_v6 = vmul.f32 0.70710677, %v165_v0  ;;  %v168_v7 = vpop.f32.mrb[2].mxu1  ;;  %v174_v22 = vmul.f32 0.5, %v159_v2 }
 0x122   :  { %283 = verf.f32 %v179_v3  ;;  %v169_v8 = vadd.f32 %v168_v7, %v83_v57  ;;  %v170_v9 = vpop.f32.mrb[3].mxu1  ;;  %v176_v25 = vmul.f32 0.5, %v165_v0 }
 0x123   :  { %285 = verf.f32 %v181_v4  ;;  %v171_v10 = vadd.f32 %v170_v9, %v87_v58 }
 0x124   :  { %287 = verf.f32 %v180_v5  ;;  %v183_v11 = vmul.f32 0.70710677, %v169_v8  ;;  %v177_v31 = vmul.f32 0.5, %v169_v8 }
 0x125   :  { %289 = verf.f32 %v182_v6  ;;  %v184_v12 = vmul.f32 0.70710677, %v171_v10  ;;  %v178_v33 = vmul.f32 0.5, %v171_v10 }
 0x126   :  { %291 = verf.f32 %v183_v11 }
 0x127   :  { %293 = verf.f32 %v184_v12 }
 0x12c   :  { %v284_v13 = vpop.eup %283 }
 0x12d   :  { %v286_v14 = vpop.eup %285  ;;  %v191_v16 = vadd.f32 1.0, %v284_v13 }
 0x12e   :  { %v288_v17 = vpop.eup %287  ;;  %v193_v19 = vadd.f32 1.0, %v286_v14 }
 0x12f   :  { %v290_v20 = vpop.eup %289  ;;  %v197_v21 = vmul.f32 %v191_v16, %v173_v15  ;;  %v192_v23 = vadd.f32 1.0, %v288_v17 }
 0x130   :  { %v199_v24 = vmul.f32 %v193_v19, %v175_v18  ;;  %v194_v26 = vadd.f32 1.0, %v290_v20  ;;  %v292_v27 = vpop.eup %291 }
 0x131   :  { %203 = vst [vmem:[#allocation7] sm:$0xff] %v197_v21  ;;  %v198_v28 = vmul.f32 %v192_v23, %v174_v22  ;;  %v294_v29 = vpop.eup %293  ;;  %v195_v32 = vadd.f32 1.0, %v292_v27 }
 0x132   :  { %205 = vst [vmem:[#allocation7 + $0x10] sm:$0xff] %v199_v24  ;;  %v200_v30 = vmul.f32 %v194_v26, %v176_v25  ;;  %v196_v34 = vadd.f32 1.0, %v294_v29 }
 0x133   :  { %204 = vst [vmem:[#allocation7 + $0x8] sm:$0xff] %v198_v28  ;;  %v201_v35 = vmul.f32 %v195_v32, %v177_v31 }
 0x134   :  { %206 = vst [vmem:[#allocation7 + $0x18] sm:$0xff] %v200_v30  ;;  %v202_v36 = vmul.f32 %v196_v34, %v178_v33 }
 0x135   :  { %207 = vst [vmem:[#allocation7 + $0x20] sm:$0xff] %v201_v35 }
 0x136   :  { %208 = vst [vmem:[#allocation7 + $0x28] sm:$0xff] %v202_v36 }
 0x137   :  { %350 = shalt.err (!%p347_p6)
}
 0x138   :  { %s351_s17 = scalar_lea.hbm %s446_s3, 768 }
 0x139   :  { %p352_p7 = scmp.ne.s32.totalorder %s446_s3, %s351_s17  ;;  %p355_p8 = scmp.lt.u32.totalorder %s351_s17, %s446_s3 }
 0x13b   :  { %p357_p9 = pnand %p355_p8, %p352_p7 }
 0x13d   :  { %360 = shalt.err (!%p357_p9)
}
 0x13e   :  { %220 = dma.vmem_to_hbm [thread:$0]  %s215_s13, 768, %s446_s3, [#allocation4], %s371_s0, %s371_s0, %s372_s9  }
 0x13f   :  { %365 = dma.done.wait [#allocation4], 768  }
 0x140   :  { %366 = vsyncadd [#allocation4], 4294966528 }
 0x141   :  { %224 = vsyncpa [#allocation3], 1 }
 0x142   :  { %225 = vsyncpa [#allocation6], 1 }
 0x143   :  { %226 = vsyncpa [#allocation4], 1 }

</bundles_post_ra>
